<compile_context>
chip_gen: v6e
topology: v6e:2x2x1
jax: 0.10.0
libtpu: 0.0.40
codegen_flags: <defaults>
</compile_context>

<pallas_src>
import functools
import math

import jax
import jax.numpy as jnp
from jax.experimental import pallas as pl
from jax.experimental.pallas import tpu as pltpu


# --------------------------------------------------------------------------
# Helpers
# --------------------------------------------------------------------------

def _pick_block(dim, target, align):
    """Largest block <= target that divides dim and is a multiple of align,
    falling back to the full dim (a full-extent block is always legal)."""
    if dim <= target or dim % align != 0:
        return dim
    b = (target // align) * align
    while b >= align:
        if dim % b == 0:
            return b
        b -= align
    return dim


# --------------------------------------------------------------------------
# Generic tiled linear (used only for one-time parameter precompute)
# --------------------------------------------------------------------------

def _linear_bias_kernel(x_ref, w_ref, b_ref, o_ref, acc_ref):
    kk = pl.program_id(1)

    @pl.when(kk == 0)
    def _():
        acc_ref[...] = jnp.zeros_like(acc_ref)

    acc_ref[...] += jnp.dot(x_ref[...], w_ref[...],
                            preferred_element_type=jnp.float32)

    @pl.when(kk == pl.num_programs(1) - 1)
    def _():
        o_ref[...] = (acc_ref[...] + b_ref[...]).astype(o_ref.dtype)


def _linear_nobias_kernel(x_ref, w_ref, o_ref, acc_ref):
    kk = pl.program_id(1)

    @pl.when(kk == 0)
    def _():
        acc_ref[...] = jnp.zeros_like(acc_ref)

    acc_ref[...] += jnp.dot(x_ref[...], w_ref[...],
                            preferred_element_type=jnp.float32)

    @pl.when(kk == pl.num_programs(1) - 1)
    def _():
        o_ref[...] = acc_ref[...].astype(o_ref.dtype)


def linear_pallas(x, w, b=None, *, bm_target=512, bk_target=512):
    """y = x @ w (+ b).  Tiled over M ('parallel') and K ('arbitrary'),
    bf16 operands, f32 VMEM accumulator.  Only used at precompute time."""
    M, K = x.shape
    K2, N = w.shape
    assert K == K2
    bm = _pick_block(M, bm_target, 8)
    bk = _pick_block(K, bk_target, 128)
    grid = (M // bm, K // bk)
    xb = x.astype(jnp.bfloat16)
    wb = w.astype(jnp.bfloat16)

    common = dict(
        out_shape=jax.ShapeDtypeStruct((M, N), jnp.float32),
        grid=grid,
        out_specs=pl.BlockSpec((bm, N), lambda i, k: (i, 0)),
        scratch_shapes=[pltpu.VMEM((bm, N), jnp.float32)],
        compiler_params=pltpu.CompilerParams(
            dimension_semantics=("parallel", "arbitrary")),
    )
    x_spec = pl.BlockSpec((bm, bk), lambda i, k: (i, k))
    w_spec = pl.BlockSpec((bk, N), lambda i, k: (k, 0))

    if b is None:
        return pl.pallas_call(_linear_nobias_kernel,
                              in_specs=[x_spec, w_spec], **common)(xb, wb)
    b2 = b.reshape(1, N).astype(jnp.float32)
    return pl.pallas_call(_linear_bias_kernel,
                          in_specs=[x_spec, w_spec,
                                    pl.BlockSpec((1, N), lambda i, k: (0, 0))],
                          **common)(xb, wb, b2)


# --------------------------------------------------------------------------
# Fused front end: masked RevIN norm + replication pad + unfold + patch embed
# --------------------------------------------------------------------------

def _frontend_kernel(xp_ref, mp_ref, w_ref, enc_ref, mean_ref, std_ref, *,
                     n_steps):
    # xp / mp: (rows, T+stride); the trailing `stride` columns are edge
    # replications of the last timestep (values AND mask), built in the
    # wrapper so no in-kernel concatenate is needed.
    xp = xp_ref[...]
    mp = mp_ref[...]
    x = xp[:, :n_steps]                    # stats over the original T steps only
    m = mp[:, :n_steps]
    cnt = jnp.maximum(jnp.sum(m, axis=1, keepdims=True), 1.0)
    mean = jnp.sum(x * m, axis=1, keepdims=True) / cnt
    xe = (x - mean) * m
    std = jnp.sqrt(jnp.sum(xe * xe, axis=1, keepdims=True) / cnt + 1e-5)
    mean_ref[...] = mean
    std_ref[...] = std

    # Normalized + replication-padded series (pad columns inherit the
    # normalized last observed value because values/mask were edge-replicated).
    xn = ((xp - mean) * mp) / std          # (rows, T+stride) f32

    # Unfold + Linear(patch_len -> d_model, bias=False) fused into ONE matmul
    # against the precomputed block-Toeplitz weight:
    #   enc[:, p*dm:(p+1)*dm] = xn[:, p*stride : p*stride+patch_len] @ w_patch
    enc_ref[...] = jnp.dot(xn.astype(jnp.bfloat16), w_ref[...],
                           preferred_element_type=jnp.float32
                           ).astype(enc_ref.dtype)


def frontend_pallas(xp_rows, mp_rows, w_big, cfg):
    """xp_rows, mp_rows: (B*N, T+stride) f32 (edge-padded).  Returns
    enc (B*N, pn*d_model) bf16 and means/stdev (B*N, 1) f32."""
    R, Tp = xp_rows.shape
    pn, dm = cfg["patch_nums"], cfg["d_model"]
    br = _pick_block(R, 256, 8)
    kernel = functools.partial(_frontend_kernel, n_steps=cfg["n_steps"])
    return pl.pallas_call(
        kernel,
        out_shape=(
            jax.ShapeDtypeStruct((R, pn * dm), jnp.bfloat16),
            jax.ShapeDtypeStruct((R, 1), jnp.float32),
            jax.ShapeDtypeStruct((R, 1), jnp.float32),
        ),
        grid=(R // br,),
        in_specs=[
            pl.BlockSpec((br, Tp), lambda i: (i, 0)),
            pl.BlockSpec((br, Tp), lambda i: (i, 0)),
            pl.BlockSpec((Tp, pn * dm), lambda i: (0, 0)),
        ],
        out_specs=(
            pl.BlockSpec((br, pn * dm), lambda i: (i, 0)),
            pl.BlockSpec((br, 1), lambda i: (i, 0)),
            pl.BlockSpec((br, 1), lambda i: (i, 0)),
        ),
        compiler_params=pltpu.CompilerParams(
            dimension_semantics=("parallel",)),
    )(xp_rows, mp_rows, w_big)


# --------------------------------------------------------------------------
# Fused Q-projection + reprogramming cross-attention + output projection
# --------------------------------------------------------------------------

def _reprogramming_kernel(x_ref, wq_ref, bq_ref, k_ref, v_ref, wo_ref, bo_ref,
                          o_ref, *, n_heads, d_keys, scale):
    # One lane-dense Q projection for ALL heads, static per-head column slices.
    q_all = jnp.dot(x_ref[...], wq_ref[...],
                    preferred_element_type=jnp.float32) + bq_ref[...]   # (bm, H*E)

    acc = jnp.zeros(o_ref.shape, jnp.float32)                           # (bm, Dout)
    for h in range(n_heads):                                            # static unroll
        q = q_all[:, h * d_keys:(h + 1) * d_keys]                       # (bm, E)
        # K pre-transposed to (E, S): plain dot, no in-kernel layout change.
        s = jnp.dot(q.astype(jnp.bfloat16), k_ref[h],
                    preferred_element_type=jnp.float32) * scale         # (bm, S)
        # softmax in f32; approx reciprocal rides on the EUP slot
        # (use approx=False if bit-parity with the PyTorch reference is needed)
        s = s - jnp.max(s, axis=-1, keepdims=True)
        p = jnp.exp(s)
        p = p * pl.reciprocal(jnp.sum(p, axis=-1, keepdims=True), approx=True)
        ctx = jnp.dot(p.astype(jnp.bfloat16), v_ref[h],
                      preferred_element_type=jnp.float32)               # (bm, E)
        acc = acc + jnp.dot(ctx.astype(jnp.bfloat16), wo_ref[h],
                            preferred_element_type=jnp.float32)         # (bm, Dout)

    o_ref[...] = (acc + bo_ref[...]).astype(o_ref.dtype)


def reprogramming_pallas(x, w_q, b_q, k_t, v, w_o, b_o, *, bm_target=512):
    """x: (M, d_model) bf16, M = batch*vars*patches query rows
    w_q: (dm, H*E) bf16, b_q: (1, H*E) f32
    k_t: (H, E, S) bf16 (pre-transposed), v: (H, S, E) bf16
    w_o: (H, E, Dout) bf16 (Dout = d_ffn, pre-truncated), b_o: (1, Dout) f32
    -> (M, Dout) bf16.

    Grid tiles M only ('parallel'); per-head work is a static in-kernel
    unroll with all (small) per-head weights VMEM-resident, so VMEM usage is
    bounded by the M tile independent of batch size."""
    M, dm = x.shape
    H, E, S = k_t.shape
    Dout = w_o.shape[-1]
    bm = _pick_block(M, bm_target, 8)
    kernel = functools.partial(_reprogramming_kernel, n_heads=H, d_keys=E,
                               scale=1.0 / math.sqrt(E))
    return pl.pallas_call(
        kernel,
        out_shape=jax.ShapeDtypeStruct((M, Dout), jnp.bfloat16),
        grid=(M // bm,),
        in_specs=[
            pl.BlockSpec((bm, dm), lambda i: (i, 0)),
            pl.BlockSpec((dm, H * E), lambda i: (0, 0)),
            pl.BlockSpec((1, H * E), lambda i: (0, 0)),
            pl.BlockSpec((H, E, S), lambda i: (0, 0, 0)),
            pl.BlockSpec((H, S, E), lambda i: (0, 0, 0)),
            pl.BlockSpec((H, E, Dout), lambda i: (0, 0, 0)),
            pl.BlockSpec((1, Dout), lambda i: (0, 0)),
        ],
        out_specs=pl.BlockSpec((bm, Dout), lambda i: (i, 0)),
        compiler_params=pltpu.CompilerParams(
            dimension_semantics=("parallel",)),
    )(x, w_q, b_q, k_t, v, w_o, b_o)


# --------------------------------------------------------------------------
# FlattenHead linear with fused RevIN de-normalization in the epilogue
# --------------------------------------------------------------------------

def _head_denorm_kernel(x_ref, w_ref, b_ref, mean_ref, std_ref, o_ref, acc_ref):
    kk = pl.program_id(1)

    @pl.when(kk == 0)
    def _():
        acc_ref[...] = jnp.zeros_like(acc_ref)

    acc_ref[...] += jnp.dot(x_ref[...], w_ref[...],
                            preferred_element_type=jnp.float32)

    @pl.when(kk == pl.num_programs(1) - 1)
    def _():
        o_ref[...] = (acc_ref[...] + b_ref[...]) * std_ref[...] + mean_ref[...]


def head_denorm_pallas(x, w, b, means, stdev, *, bm_target=256, bk_target=1024):
    """x: (B*N, pn*d_ffn) bf16, w: (pn*d_ffn, Npad) bf16 (Npad = 128-multiple),
    b: (1, Npad) f32, means/stdev: (B*N, 1) f32 -> (B*N, Npad) f32."""
    M, K = x.shape
    Np = w.shape[-1]
    bm = _pick_block(M, bm_target, 8)
    bk = _pick_block(K, bk_target, 128)
    return pl.pallas_call(
        _head_denorm_kernel,
        out_shape=jax.ShapeDtypeStruct((M, Np), jnp.float32),
        grid=(M // bm, K // bk),
        in_specs=[
            pl.BlockSpec((bm, bk), lambda i, k: (i, k)),
            pl.BlockSpec((bk, Np), lambda i, k: (k, 0)),
            pl.BlockSpec((1, Np), lambda i, k: (0, 0)),
            pl.BlockSpec((bm, 1), lambda i, k: (i, 0)),
            pl.BlockSpec((bm, 1), lambda i, k: (i, 0)),
        ],
        out_specs=pl.BlockSpec((bm, Np), lambda i, k: (i, 0)),
        scratch_shapes=[pltpu.VMEM((bm, Np), jnp.float32)],
        compiler_params=pltpu.CompilerParams(
            dimension_semantics=("parallel", "arbitrary")),
    )(x, w, b, means, stdev)


# --------------------------------------------------------------------------
# One-time precompute of everything that depends only on parameters
# --------------------------------------------------------------------------

def precompute_static(params, cfg):
    H, E = cfg["n_heads"], cfg["d_keys"]
    S, dffn = cfg["num_tokens"], cfg["d_ffn"]
    dm, plen, stride = cfg["d_model"], cfg["patch_len"], cfg["stride"]
    pn, T, npred = cfg["patch_nums"], cfg["n_steps"], cfg["n_pred_steps"]

    # text-prototype mapping + K/V projections (param-only, one-time)
    src = linear_pallas(params["word_emb"].T, params["w_map"], params["b_map"]).T
    k = linear_pallas(src, params["w_k"], params["b_k"]).reshape(S, H, E)
    v = linear_pallas(src, params["w_v"], params["b_v"]).reshape(S, H, E)

    # Block-Toeplitz patch-embedding weight: one matmul performs the whole
    # unfold + Linear(patch_len -> d_model) with a lane-dense output.
    w_big = jnp.zeros((T + stride, pn * dm), jnp.float32)
    for p in range(pn):
        w_big = w_big.at[p * stride:p * stride + plen,
                         p * dm:(p + 1) * dm].set(params["w_patch"])

    # Output projection truncated to the first d_ffn columns (valid while the
    # frozen LLM body is identity -- see TODO in timellm_forward).
    w_o_t = params["w_o"][:, :dffn].reshape(H, E, dffn)
    b_o_t = params["b_o"][:dffn].reshape(1, dffn)

    # FlattenHead weight: permute rows from the torch (d_ffn, pn) flattening
    # order to (pn, d_ffn) so the activation needs no transpose, and pad the
    # output columns to a 128 multiple for lane-dense stores.
    npad = ((npred + 127) // 128) * 128
    wh = params["w_head"].reshape(dffn, pn, npred).transpose(1, 0, 2)
    wh = wh.reshape(pn * dffn, npred)
    wh_pad = jnp.zeros((pn * dffn, npad), jnp.float32).at[:, :npred].set(wh)
    bh_pad = jnp.zeros((1, npad), jnp.float32).at[:, :npred].set(
        params["b_head"].reshape(1, npred))

    return {
        "w_patch_big": w_big.astype(jnp.bfloat16),                    # (T+stride, pn*dm)
        "w_q": params["w_q"].astype(jnp.bfloat16),                    # (dm, H*E)
        "b_q": params["b_q"].reshape(1, H * E).astype(jnp.float32),
        "k_t": jnp.transpose(k, (1, 2, 0)).astype(jnp.bfloat16),      # (H, E, S)
        "v": jnp.transpose(v, (1, 0, 2)).astype(jnp.bfloat16),        # (H, S, E)
        "w_o": w_o_t.astype(jnp.bfloat16),                            # (H, E, d_ffn)
        "b_o": b_o_t.astype(jnp.float32),                             # (1, d_ffn)
        "w_head": wh_pad.astype(jnp.bfloat16),                        # (pn*d_ffn, npad)
        "b_head": bh_pad,                                             # (1, npad)
    }


# --------------------------------------------------------------------------
# Forward pass (glue in plain JAX, compute in Pallas)
# --------------------------------------------------------------------------

def timellm_forward(inputs, consts, cfg):
    X, missing_mask = inputs["X"], inputs["missing_mask"]
    B, T, N = X.shape
    pn, dm, dffn = cfg["patch_nums"], cfg["d_model"], cfg["d_ffn"]
    stride, npred = cfg["stride"], cfg["n_pred_steps"]

    # channel-independent rows (B, T, N) -> (B*N, T); replication-pad values
    # AND mask by `stride` in the wrapper (tiny op) so kernels need no concat.
    x_rows = jnp.transpose(X.astype(jnp.float32), (0, 2, 1)).reshape(B * N, T)
    m_rows = jnp.transpose(missing_mask.astype(jnp.float32), (0, 2, 1)).reshape(B * N, T)
    xp = jnp.concatenate([x_rows, jnp.repeat(x_rows[:, -1:], stride, axis=1)], axis=1)
    mp = jnp.concatenate([m_rows, jnp.repeat(m_rows[:, -1:], stride, axis=1)], axis=1)

    # fused masked RevIN norm + replication pad + unfold + patch embedding
    enc, means, stdev = frontend_pallas(xp, mp, consts["w_patch_big"], cfg)
    enc_flat = enc.reshape(B * N * pn, dm)       # free reshape, rows ordered (b, n, p)

    # fused Q-projection + reprogramming cross-attention + (truncated) out-projection
    rep = reprogramming_pallas(enc_flat, consts["w_q"], consts["b_q"],
                               consts["k_t"], consts["v"],
                               consts["w_o"], consts["b_o"])            # (B*N*pn, d_ffn)

    # TODO(synk): prompt tokenization (HF tokenizer) + frozen pretrained LLM body
    # (GPT-2/LLaMA) have no clean Pallas equivalent; the LLM is treated as identity
    # over the reprogrammed patch embeddings (prompt-prefix tokens would be dropped
    # by the trailing [-patch_nums:] slice anyway under this approximation).

    # FlattenHead + fused RevIN de-normalization: head weight rows were
    # pre-permuted so the activation reshapes with zero data movement.
    flat = rep.reshape(B * N, pn * dffn)
    out = head_denorm_pallas(flat, consts["w_head"], consts["b_head"],
                             means, stdev)                              # (B*N, npad)
    out = out[:, :npred].reshape(B, N, npred)
    forecasting = jnp.transpose(out, (0, 2, 1))                         # (B, npred, N)
    # reference's trailing [:, -n_pred_steps:] is an identity slice here
    return {"forecasting_data": forecasting}


# --------------------------------------------------------------------------
# Deterministic parameter init + demo run
# --------------------------------------------------------------------------

if __name__ == "__main__":
    cfg = dict(n_steps=16, n_features=3, n_pred_steps=4, n_pred_features=3,
               patch_len=4, stride=2, d_model=32, d_ffn=32, d_llm=64,
               n_heads=4, vocab=160, num_tokens=32)
    cfg["d_keys"] = cfg["d_model"] // cfg["n_heads"]
    cfg["patch_nums"] = (cfg["n_steps"] - cfg["patch_len"]) // cfg["stride"] + 2

    key = jax.random.PRNGKey(0)
    keys = jax.random.split(key, 10)

    def init(k, shape):
        return 0.02 * jax.random.normal(k, shape, jnp.float32)

    hk = cfg["n_heads"] * cfg["d_keys"]
    params = {
        "w_patch": init(keys[0], (cfg["patch_len"], cfg["d_model"])),   # bias=False
        "word_emb": init(keys[1], (cfg["vocab"], cfg["d_llm"])),
        "w_map": init(keys[2], (cfg["vocab"], cfg["num_tokens"])),
        "b_map": jnp.zeros((cfg["num_tokens"],), jnp.float32),
        "w_q": init(keys[3], (cfg["d_model"], hk)),
        "b_q": jnp.zeros((hk,), jnp.float32),
        "w_k": init(keys[4], (cfg["d_llm"], hk)),
        "b_k": jnp.zeros((hk,), jnp.float32),
        "w_v": init(keys[5], (cfg["d_llm"], hk)),
        "b_v": jnp.zeros((hk,), jnp.float32),
        "w_o": init(keys[6], (hk, cfg["d_llm"])),
        "b_o": jnp.zeros((cfg["d_llm"],), jnp.float32),
        "w_head": init(keys[7], (cfg["d_ffn"] * cfg["patch_nums"], cfg["n_pred_steps"])),
        "b_head": jnp.zeros((cfg["n_pred_steps"],), jnp.float32),
    }

    # param-only work: computed once, reused for every forward
    consts = jax.tree_util.tree_map(jax.block_until_ready,
                                    precompute_static(params, cfg))

    B = 2
    X = jax.random.normal(keys[8], (B, cfg["n_steps"], cfg["n_features"]), jnp.float32)
    missing_mask = (jax.random.uniform(keys[9], X.shape) > 0.1).astype(jnp.float32)

    fwd = jax.jit(lambda inp: timellm_forward(inp, consts, cfg))
    results = fwd({"X": X, "missing_mask": missing_mask})
    out = jax.block_until_ready(results["forecasting_data"])
    assert out.shape == (B, cfg["n_pred_steps"], cfg["n_pred_features"])
    assert bool(jnp.all(jnp.isfinite(out)))
    print("KERNEL_OK")
</pallas_src>

<mosaic_0001>
module attributes {stable_mosaic.version = 11 : i64} {
  func.func @_linear_bias_kernel(%arg0: i32, %arg1: i32, %arg2: memref<64x160xbf16, #tpu.memory_space<vmem>>, %arg3: memref<160x32xbf16, #tpu.memory_space<vmem>>, %arg4: memref<1x32xf32, #tpu.memory_space<vmem>>, %arg5: memref<64x32xf32, #tpu.memory_space<vmem>>, %arg6: memref<64x32xf32, #tpu.memory_space<vmem>>) attributes {dimension_semantics = [#tpu.dimension_semantics<parallel>, #tpu.dimension_semantics<arbitrary>], iteration_bounds = array<i64: 1, 1>, scalar_prefetch = 0 : i64, scratch_operands = 1 : i64, tpu.core_type = #tpu.core_type<tc>, window_params = [{transform_indices = @transform_0, window_bounds = array<i64: 64, 160>}, {transform_indices = @transform_1, window_bounds = array<i64: 160, 32>}, {pipeline_mode = #tpu.pipeline_mode<synchronous>, transform_indices = @transform_2, window_bounds = array<i64: 1, 32>}, {transform_indices = @transform_3, window_bounds = array<i64: 64, 32>}]} {
    %c0_i32 = arith.constant 0 : i32
    %0 = arith.cmpi eq, %arg1, %c0_i32 : i32
    %1 = arith.extui %0 : i1 to i32
    %c0_i32_0 = arith.constant 0 : i32
    %2 = arith.cmpi ne, %1, %c0_i32_0 : i32
    scf.if %2 {
      %cst_10 = arith.constant 0.000000e+00 : f32
      %12 = vector.broadcast %cst_10 : f32 to vector<64x32xf32>
      %c0_11 = arith.constant 0 : index
      %c0_12 = arith.constant 0 : index
      %13 = vector.load %arg6[%c0_11, %c0_12] : memref<64x32xf32, #tpu.memory_space<vmem>>, vector<64x32xf32>
      tpu.vector_store %arg6[%c0_11, %c0_12], %12 {strides = array<i32>} : memref<64x32xf32, #tpu.memory_space<vmem>>, vector<64x32xf32>,
    } else {
    }
    %c0 = arith.constant 0 : index
    %c0_1 = arith.constant 0 : index
    %3 = vector.load %arg6[%c0, %c0_1] : memref<64x32xf32, #tpu.memory_space<vmem>>, vector<64x32xf32>
    %c0_2 = arith.constant 0 : index
    %c0_3 = arith.constant 0 : index
    %4 = vector.load %arg2[%c0_2, %c0_3] : memref<64x160xbf16, #tpu.memory_space<vmem>>, vector<64x160xbf16>
    %c0_4 = arith.constant 0 : index
    %c0_5 = arith.constant 0 : index
    %5 = vector.load %arg3[%c0_4, %c0_5] : memref<160x32xbf16, #tpu.memory_space<vmem>>, vector<160x32xbf16>
    %cst = arith.constant dense<0.000000e+00> : vector<64x32xf32>
    %6 = tpu.matmul %4, %5, %cst {dimension_numbers = #tpu.dot_dimension_numbers<[1], [0], [0], [1], [0, 0, 1, 1], [], []>} : vector<64x160xbf16>, vector<160x32xbf16>, vector<64x32xf32> -> vector<64x32xf32>
    %7 = arith.addf %3, %6 : vector<64x32xf32>
    %c0_6 = arith.constant 0 : index
    %c0_7 = arith.constant 0 : index
    %8 = vector.load %arg6[%c0_6, %c0_7] : memref<64x32xf32, #tpu.memory_space<vmem>>, vector<64x32xf32>
    tpu.vector_store %arg6[%c0_6, %c0_7], %7 {strides = array<i32>} : memref<64x32xf32, #tpu.memory_space<vmem>>, vector<64x32xf32>,
    %c0_i32_8 = arith.constant 0 : i32
    %9 = arith.cmpi eq, %arg1, %c0_i32_8 : i32
    %10 = arith.extui %9 : i1 to i32
    %c0_i32_9 = arith.constant 0 : i32
    %11 = arith.cmpi ne, %10, %c0_i32_9 : i32
    scf.if %11 {
      %c0_10 = arith.constant 0 : index
      %c0_11 = arith.constant 0 : index
      %12 = vector.load %arg6[%c0_10, %c0_11] : memref<64x32xf32, #tpu.memory_space<vmem>>, vector<64x32xf32>
      %c0_12 = arith.constant 0 : index
      %c0_13 = arith.constant 0 : index
      %13 = vector.load %arg4[%c0_12, %c0_13] : memref<1x32xf32, #tpu.memory_space<vmem>>, vector<1x32xf32>
      %14 = vector.broadcast %13 : vector<1x32xf32> to vector<64x32xf32>
      %15 = arith.addf %12, %14 : vector<64x32xf32>
      %c0_14 = arith.constant 0 : index
      %c0_15 = arith.constant 0 : index
      %16 = vector.load %arg5[%c0_14, %c0_15] : memref<64x32xf32, #tpu.memory_space<vmem>>, vector<64x32xf32>
      tpu.vector_store %arg5[%c0_14, %c0_15], %15 {strides = array<i32>} : memref<64x32xf32, #tpu.memory_space<vmem>>, vector<64x32xf32>,
    } else {
    }
    return
  }
  func.func @transform_0(%arg0: i32, %arg1: i32) -> (i32, i32) {
    %c0_i32 = arith.constant 0 : i32
    return %arg0, %arg1 : i32, i32
  }
  func.func @transform_1(%arg0: i32, %arg1: i32) -> (i32, i32) {
    %c0_i32 = arith.constant 0 : i32
    %c0_i32_0 = arith.constant 0 : i32
    return %arg1, %c0_i32 : i32, i32
  }
  func.func @transform_2(%arg0: i32, %arg1: i32) -> (i32, i32) {
    %c0_i32 = arith.constant 0 : i32
    %c0_i32_0 = arith.constant 0 : i32
    %c0_i32_1 = arith.constant 0 : i32
    return %c0_i32, %c0_i32_0 : i32, i32
  }
  func.func @transform_3(%arg0: i32, %arg1: i32) -> (i32, i32) {
    %c0_i32 = arith.constant 0 : i32
    %c0_i32_0 = arith.constant 0 : i32
    return %arg0, %c0_i32 : i32, i32
  }
}

</mosaic_0001>

<bundles_post_ra>
// kernel: tpu_custom_call.1
= control target key start
LH: loop header
LB: loop body
LE: loop exit
PB: predicated region body
PF: predicated region fallthrough
CT: control target
= control target key end

     0   :  { %vm19_vm0 = vcmask 261120   ;;  %v359_v0 = vmov 0   ;;  %v360_v2 = vmov 0.0   ;;  %s490_s1 = inlined_call_operand.vmem [shape: bf16[160,32], index: 1, kind: input, shape index: {}]   ;;  %s491_s0 = inlined_call_operand.vmem [shape: bf16[64,160], index: 0, kind: input, shape index: {}]   ;;  %s492_s2 = inlined_call_operand.vmem [shape: f32[1,32], index: 2, kind: input, shape index: {}]   ;;  %s493_s3 = inlined_call_operand.vmem [shape: f32[64,32], index: 3, kind: output, shape index: {}]  }
   0x1   :  { %173 = vmatprep.subr.bf16.mxu0 %v359_v0  ;;  %315 = vmatprep.subr.bf16.mxu1 %v359_v0  ;;  %v337_v1 = vld [vmem:[%s490_s1 + $0x38] sm:$0xff]   ;;  %20 = vst.msk [vmem:[#allocation2] sm:$0xff] %vm19_vm0, %v360_v2  ;;  %21 = vst.msk [vmem:[#allocation2 + $0x8] sm:$0xff] %vm19_vm0, %v360_v2  ;;  %v338_v3 = vld [vmem:[%s490_s1 + $0x30] sm:$0xff]  }
   0x2   :  { %22 = vst.msk [vmem:[#allocation2 + $0x10] sm:$0xff] %vm19_vm0, %v360_v2  ;;  %23 = vst.msk [vmem:[#allocation2 + $0x18] sm:$0xff] %vm19_vm0, %v360_v2  ;;  %174 = vmatpush1.bf16.msra.mxu0 %v337_v1  ;;  %325 = vmatpush1.bf16.msra.mxu1 %v337_v1  ;;  %v339_v4 = vld [vmem:[%s490_s1 + $0x28] sm:$0xff]   ;;  %v340_v5 = vld [vmem:[%s490_s1 + $0x20] sm:$0xff]  }
   0x3   :  { %24 = vst.msk [vmem:[#allocation2 + $0x20] sm:$0xff] %vm19_vm0, %v360_v2  ;;  %25 = vst.msk [vmem:[#allocation2 + $0x28] sm:$0xff] %vm19_vm0, %v360_v2  ;;  %175 = vmatprep.subr.bf16.mxu0 %v359_v0  ;;  %316 = vmatprep.subr.bf16.mxu1 %v359_v0  ;;  %v349_v6 = vld [vmem:[%s491_s0 + $0x4] ss:$8 sps:$4 sm:$0xff]   ;;  %v341_v8 = vld [vmem:[%s490_s1 + $0x18] sm:$0xff]  }
   0x4   :  { %26 = vst.msk [vmem:[#allocation2 + $0x30] sm:$0xff] %vm19_vm0, %v360_v2  ;;  %27 = vst.msk [vmem:[#allocation2 + $0x38] sm:$0xff] %vm19_vm0, %v360_v2  ;;  %v352_v7 = vld [vmem:[%s491_s0 + $0x24] ss:$8 sps:$4 sm:$0xff]   ;;  %310 = vmatprep.mubr.msk.bf16.mxu0 %vm19_vm0, %v349_v6  ;;  %v342_v9 = vld [vmem:[%s490_s1 + $0x10] sm:$0xff]  }
   0x5   :  { %312 = vmatprep.mubr.msk.bf16.mxu1 %vm19_vm0, %v352_v7  ;;  %v343_v10 = vld [vmem:[%s490_s1 + $0x8] sm:$0xff]   ;;  %v344_v11 = vld [vmem:[%s490_s1] sm:$0xff]   ;;  %v353_v16 = vld [vmem:[%s491_s0 + $0x14] ss:$8 sps:$4 sm:$0xff]  }
   0x6   :  { %176 = vmatpush1.bf16.msra.mxu0 %v338_v3  ;;  %326 = vmatpush1.bf16.msra.mxu1 %v338_v3  ;;  %v345_v12 = vld [vmem:[%s490_s1 + $0x48] sm:$0xff]   ;;  %v346_v13 = vld [vmem:[%s490_s1 + $0x40] sm:$0xff]   ;;  %v355_v17 = vld [vmem:[%s491_s0 + $0x34] ss:$8 sps:$4 sm:$0xff]  }
   0x7   :  { %177 = vmatprep.subr.bf16.mxu0 %v359_v0  ;;  %317 = vmatprep.subr.bf16.mxu1 %v359_v0  ;;  %v347_v14 = vld [vmem:[%s491_s0] ss:$8 sps:$4 sm:$0xff]   ;;  %v357_v18 = vld [vmem:[%s491_s0 + $0x10] ss:$8 sps:$4 sm:$0xff]  }
   0x8   :  { %v350_v15 = vld [vmem:[%s491_s0 + $0x20] ss:$8 sps:$4 sm:$0xff]   ;;  %v358_v19 = vld [vmem:[%s491_s0 + $0x30] ss:$8 sps:$4 sm:$0xff]  }
   0x9   :  { %v28_v20 = vld [vmem:[#allocation2] sm:$0xff]  ;;  %v29_v28 = vld [vmem:[#allocation2 + $0x8] sm:$0xff]  ;;  %v30_v36 = vld [vmem:[#allocation2 + $0x10] sm:$0xff] }
   0xa   :  { %178 = vmatpush1.bf16.msra.mxu0 %v339_v4  ;;  %327 = vmatpush1.bf16.msra.mxu1 %v339_v4  ;;  %v32_v21 = vld [vmem:[#allocation2 + $0x20] sm:$0xff]  ;;  %v33_v29 = vld [vmem:[#allocation2 + $0x28] sm:$0xff]  ;;  %v31_v43 = vld [vmem:[#allocation2 + $0x18] sm:$0xff] }
   0xb   :  { %179 = vmatprep.subr.bf16.mxu0 %v359_v0  ;;  %318 = vmatprep.subr.bf16.mxu1 %v359_v0  ;;  %v34_v37 = vld [vmem:[#allocation2 + $0x30] sm:$0xff]  ;;  %v314_v38 = vld [vmem:[%s492_s2] ss:$0 sm:$0xff]  ;;  %v35_v48 = vld [vmem:[#allocation2 + $0x38] sm:$0xff] }
   0xe   :  { %180 = vmatpush1.bf16.msra.mxu0 %v340_v5  ;;  %328 = vmatpush1.bf16.msra.mxu1 %v340_v5 }
   0xf   :  { %181 = vmatprep.subr.bf16.mxu0 %v359_v0  ;;  %319 = vmatprep.subr.bf16.mxu1 %v359_v0 }
  0x12   :  { %182 = vmatpush1.bf16.msra.mxu0 %v341_v8  ;;  %329 = vmatpush1.bf16.msra.mxu1 %v341_v8 }
  0x13   :  { %183 = vmatprep.subr.bf16.mxu0 %v359_v0  ;;  %320 = vmatprep.subr.bf16.mxu1 %v359_v0 }
  0x16   :  { %184 = vmatpush1.bf16.msra.mxu0 %v342_v9  ;;  %330 = vmatpush1.bf16.msra.mxu1 %v342_v9 }
  0x17   :  { %185 = vmatprep.subr.bf16.mxu0 %v359_v0  ;;  %321 = vmatprep.subr.bf16.mxu1 %v359_v0 }
  0x1a   :  { %186 = vmatpush1.bf16.msra.mxu0 %v343_v10  ;;  %331 = vmatpush1.bf16.msra.mxu1 %v343_v10 }
  0x1b   :  { %187 = vmatprep.subr.bf16.mxu0 %v359_v0  ;;  %322 = vmatprep.subr.bf16.mxu1 %v359_v0 }
  0x1e   :  { %188 = vmatpush1.bf16.msra.mxu0 %v344_v11  ;;  %332 = vmatpush1.bf16.msra.mxu1 %v344_v11 }
  0x1f   :  { %201 = vmatprep.subr.bf16.mxu0 %v359_v0  ;;  %323 = vmatprep.subr.bf16.mxu1 %v359_v0 }
  0x22   :  { %202 = vmatpush2.bf16.msra.mxu0 %v345_v12  ;;  %333 = vmatpush2.bf16.msra.mxu1 %v345_v12 }
  0x23   :  { %203 = vmatprep.subr.bf16.mxu0 %v359_v0  ;;  %324 = vmatprep.subr.bf16.mxu1 %v359_v0 }
  0x26   :  { %204 = vmatpush2.bf16.msra.mxu0 %v346_v13  ;;  %334 = vmatpush2.bf16.msra.mxu1 %v346_v13 }
  0x29   :  { %206 = vmatmul.mubr.bf16.vlgmr.msra.gmra.mxu0 %v347_v14  ;;  %222 = vmatmul.mubr.bf16.vlgmr.msra.gmra.mxu1 %v350_v15 }
  0x2a   :  { %311 = vmatprep.mubr.msk.bf16.mxu0 %vm19_vm0, %v353_v16  ;;  %313 = vmatprep.mubr.msk.bf16.mxu1 %vm19_vm0, %v355_v17 }
  0x31   :  { %214 = vmatmul.mubr.bf16.gmra.mxu0 %v357_v18  ;;  %230 = vmatmul.mubr.bf16.gmra.mxu1 %v358_v19 }
  0xe9   :  { %v207_v22 = vpop.f32.mrf.mxu0  ;;  %v223_v23 = vpop.f32.mrf.mxu1 }
  0xea   :  { %v238_v24 = vadd.f32 %v207_v22, %v28_v20  ;;  %v242_v25 = vadd.f32 %v223_v23, %v32_v21 }
  0xeb   :  { %v209_v26 = vpop.f32.mrf.mxu0  ;;  %v225_v27 = vpop.f32.mrf.mxu1 }
  0xec   :  { %246 = vst.msk [vmem:[#allocation2] sm:$0xff] %vm19_vm0, %v238_v24  ;;  %250 = vst.msk [vmem:[#allocation2 + $0x20] sm:$0xff] %vm19_vm0, %v242_v25 }
  0xed   :  { %v210_v30 = vpop.f32.mrf.mxu0  ;;  %v226_v31 = vpop.f32.mrf.mxu1 }
  0xee   :  { %v239_v32 = vadd.f32 %v210_v30, %v29_v28  ;;  %v243_v33 = vadd.f32 %v226_v31, %v33_v29 }
  0xef   :  { %v212_v34 = vpop.f32.mrf.mxu0  ;;  %v228_v35 = vpop.f32.mrf.mxu1 }
  0xf0   :  { %247 = vst.msk [vmem:[#allocation2 + $0x8] sm:$0xff] %vm19_vm0, %v239_v32  ;;  %251 = vst.msk [vmem:[#allocation2 + $0x28] sm:$0xff] %vm19_vm0, %v243_v33 }
  0xf1   :  { %v215_v39 = vpop.f32.mrf.mxu0  ;;  %v231_v40 = vpop.f32.mrf.mxu1 }
  0xf2   :  { %v240_v41 = vadd.f32 %v215_v39, %v30_v36  ;;  %v244_v42 = vadd.f32 %v231_v40, %v34_v37 }
  0xf3   :  { %v257_v44 = vld [vmem:[#allocation2] sm:$0xff]  ;;  %v217_v46 = vpop.f32.mrf.mxu0  ;;  %v233_v47 = vpop.f32.mrf.mxu1 }
  0xf4   :  { %v261_v45 = vld [vmem:[#allocation2 + $0x20] sm:$0xff]  ;;  %v272_v49 = vadd.f32 %v314_v38, %v257_v44  ;;  %248 = vst.msk [vmem:[#allocation2 + $0x10] sm:$0xff] %vm19_vm0, %v240_v41  ;;  %252 = vst.msk [vmem:[#allocation2 + $0x30] sm:$0xff] %vm19_vm0, %v244_v42 }
  0xf5   :  { %v276_v50 = vadd.f32 %v314_v38, %v261_v45  ;;  %v218_v51 = vpop.f32.mrf.mxu0  ;;  %v234_v52 = vpop.f32.mrf.mxu1 }
  0xf6   :  { %280 = vst.msk [vmem:[%s493_s3] sm:$0xff] %vm19_vm0, %v272_v49  ;;  %v241_v53 = vadd.f32 %v218_v51, %v31_v43  ;;  %v245_v54 = vadd.f32 %v234_v52, %v35_v48 }
  0xf7   :  { %284 = vst.msk [vmem:[%s493_s3 + $0x20] sm:$0xff] %vm19_vm0, %v276_v50  ;;  %v258_v55 = vld [vmem:[#allocation2 + $0x8] sm:$0xff]  ;;  %v220_v57 = vpop.f32.mrf.mxu0  ;;  %v236_v58 = vpop.f32.mrf.mxu1 }
  0xf8   :  { %v262_v56 = vld [vmem:[#allocation2 + $0x28] sm:$0xff]  ;;  %v273_v59 = vadd.f32 %v314_v38, %v258_v55  ;;  %249 = vst.msk [vmem:[#allocation2 + $0x18] sm:$0xff] %vm19_vm0, %v241_v53  ;;  %253 = vst.msk [vmem:[#allocation2 + $0x38] sm:$0xff] %vm19_vm0, %v245_v54 }
  0xf9   :  { %v277_v60 = vadd.f32 %v314_v38, %v262_v56 }
  0xfa   :  { %281 = vst.msk [vmem:[%s493_s3 + $0x8] sm:$0xff] %vm19_vm0, %v273_v59 }
  0xfb   :  { %285 = vst.msk [vmem:[%s493_s3 + $0x28] sm:$0xff] %vm19_vm0, %v277_v60  ;;  %v259_v61 = vld [vmem:[#allocation2 + $0x10] sm:$0xff] }
  0xfc   :  { %v263_v62 = vld [vmem:[#allocation2 + $0x30] sm:$0xff]  ;;  %v274_v63 = vadd.f32 %v314_v38, %v259_v61 }
  0xfd   :  { %v278_v0 = vadd.f32 %v314_v38, %v263_v62 }
  0xfe   :  { %282 = vst.msk [vmem:[%s493_s3 + $0x10] sm:$0xff] %vm19_vm0, %v274_v63 }
  0xff   :  { %286 = vst.msk [vmem:[%s493_s3 + $0x30] sm:$0xff] %vm19_vm0, %v278_v0  ;;  %v260_v1 = vld [vmem:[#allocation2 + $0x18] sm:$0xff] }
 0x100   :  { %v264_v2 = vld [vmem:[#allocation2 + $0x38] sm:$0xff]  ;;  %v275_v3 = vadd.f32 %v314_v38, %v260_v1 }
 0x101   :  { %v279_v4 = vadd.f32 %v314_v38, %v264_v2 }
 0x102   :  { %283 = vst.msk [vmem:[%s493_s3 + $0x18] sm:$0xff] %vm19_vm0, %v275_v3 }
 0x103   :  { %287 = vst.msk [vmem:[%s493_s3 + $0x38] sm:$0xff] %vm19_vm0, %v279_v4 }

</bundles_post_ra>
